<compile_context>
chip_gen: v5e
topology: v5e:2x2
jax: 0.10.0
libtpu: 0.0.40
codegen_flags: <defaults>
</compile_context>

<pallas_src>
import jax
import jax.numpy as jnp
from jax.experimental import pallas as pl
from jax.experimental.pallas import tpu as pltpu


def _vit_embeddings_kernel(patches_ref, w_ref, add_ref, out_ref):
    # patches_ref: (BB, seq, K)      matmul dtype; row 0 of each image is zero
    # w_ref:       (K, hidden)       matmul dtype; resident across the grid
    # add_ref:     (seq, hidden) f32; row 0 = cls+pos[0], rows 1.. = bias+pos[1:]
    # out_ref:     (BB, seq, hidden) f32
    add = add_ref[...]                      # hoisted: one load per grid step
    bb = patches_ref.shape[0]               # static
    for i in range(bb):                     # static unroll, small BB
        proj = jnp.dot(
            patches_ref[i], w_ref[...], preferred_element_type=jnp.float32
        )
        # single aligned full-slab store per image (no pl.ds offset-1 writes)
        out_ref[i] = (proj + add).astype(out_ref.dtype)


def _pick_batch_block(batch, seq):
    """~512-1024 M rows per step, >=2 parallel grid steps, divides batch."""
    target_rows = 1024
    bb = max(1, min(batch, target_rows // max(seq, 1)))
    while bb > 1 and batch // bb < 2:       # keep both v7x TCs busy
        bb -= 1
    while bb > 1 and batch % bb != 0:       # keep the grid exact
        bb -= 1
    return bb


def vit_embeddings(image, conv_weight, conv_bias, cls_token, pos_emb,
                   patch_size, *, matmul_dtype=jnp.bfloat16, batch_block=None):
    """image: (B, C, H, W) NCHW float32 -> (B, num_patches+1, hidden) float32."""
    B, C, H, W = image.shape
    P = patch_size
    Hp, Wp = H // P, W // P
    num_patches = Hp * Wp
    hidden = conv_weight.shape[0]
    K = C * P * P
    seq = num_patches + 1

    # --- glue: patchify (pure reshape/transpose), K flattened as (c, kh, kw) ---
    x = image.reshape(B, C, Hp, P, Wp, P)
    x = x.transpose(0, 2, 4, 1, 3, 5)                 # (B, Hp, Wp, C, P, P)
    patches = x.reshape(B, num_patches, K)            # (B, NP, K)

    # Fold CLS into the matmul: prepend an all-zero patch row per image.
    patches_aug = jnp.concatenate(
        [jnp.zeros((B, 1, K), patches.dtype), patches], axis=1
    ).astype(matmul_dtype)                            # (B, seq, K)

    w_flat = conv_weight.reshape(hidden, K).T.astype(matmul_dtype)  # (K, hidden)

    # Per-row additive epilogue table (f32):
    #   row 0      -> cls + pos[0]        (zero patch row contributes nothing)
    #   rows 1..NP -> conv_bias + pos[1:]
    pos = pos_emb.reshape(seq, hidden).astype(jnp.float32)
    cls_row = cls_token.reshape(1, hidden).astype(jnp.float32)
    bias_row = conv_bias.reshape(1, hidden).astype(jnp.float32)
    add_tab = jnp.concatenate([cls_row + pos[0:1], pos[1:] + bias_row], axis=0)

    bb = _pick_batch_block(B, seq) if batch_block is None else batch_block
    assert B % bb == 0, "batch_block must divide batch"

    out = pl.pallas_call(
        _vit_embeddings_kernel,
        out_shape=jax.ShapeDtypeStruct((B, seq, hidden), jnp.float32),
        grid_spec=pltpu.PrefetchScalarGridSpec(
            num_scalar_prefetch=0,
            grid=(B // bb,),
            in_specs=[
                pl.BlockSpec((bb, seq, K), lambda g: (g, 0, 0)),
                pl.BlockSpec((K, hidden), lambda g: (0, 0)),     # weight resident
                pl.BlockSpec((seq, hidden), lambda g: (0, 0)),   # add table resident
            ],
            out_specs=pl.BlockSpec((bb, seq, hidden), lambda g: (g, 0, 0)),
        ),
        compiler_params=pltpu.CompilerParams(
            dimension_semantics=("parallel",),
            vmem_limit_bytes=32 * 1024 * 1024,
        ),
    )(patches_aug, w_flat, add_tab)
    return out


def reference(image, conv_weight, conv_bias, cls_token, pos_emb, patch_size):
    """Plain-JAX f32 reference of the PyTorch forward (eval mode)."""
    B, C, H, W = image.shape
    P = patch_size
    hidden = conv_weight.shape[0]
    proj = jax.lax.conv_general_dilated(
        image, conv_weight, window_strides=(P, P), padding="VALID",
        dimension_numbers=("NCHW", "OIHW", "NCHW"),
    ) + conv_bias.reshape(1, hidden, 1, 1)
    emb = proj.reshape(B, hidden, -1).transpose(0, 2, 1)        # (B, NP, hidden)
    cls = jnp.broadcast_to(cls_token.reshape(1, 1, hidden), (B, 1, hidden))
    emb = jnp.concatenate([cls, emb], axis=1)
    return emb + pos_emb.reshape(1, -1, hidden)


if __name__ == "__main__":
    # Small ViT config: image 16x16, patch 4, channels 4, hidden 32, batch 2.
    image_size = (16, 16)
    patch_size = 4
    num_channels = 4
    hidden_size = 32
    batch = 2
    num_patches = (image_size[0] // patch_size) * (image_size[1] // patch_size)

    key = jax.random.PRNGKey(0)
    k_img, k_w, k_b, k_cls, k_pos = jax.random.split(key, 5)

    image = jax.random.normal(
        k_img, (batch, num_channels, image_size[0], image_size[1]), jnp.float32
    )
    conv_weight = jax.random.normal(
        k_w, (hidden_size, num_channels, patch_size, patch_size), jnp.float32
    ) * 0.02
    conv_bias = jax.random.normal(k_b, (hidden_size,), jnp.float32) * 0.02
    cls_token = jax.random.normal(k_cls, (1, 1, hidden_size), jnp.float32)
    pos_emb = jax.random.normal(
        k_pos, (1, num_patches + 1, hidden_size), jnp.float32
    )

    ref = reference(image, conv_weight, conv_bias, cls_token, pos_emb, patch_size)

    # Production path: bf16 matmul inputs, f32 accumulate / epilogue.
    out_bf16 = vit_embeddings(
        image, conv_weight, conv_bias, cls_token, pos_emb, patch_size
    )
    out_bf16 = jax.block_until_ready(out_bf16)
    assert out_bf16.shape == (batch, num_patches + 1, hidden_size)
    assert jnp.allclose(out_bf16, ref, atol=3e-2, rtol=3e-2)

    # Tight numerical check of the kernel structure with f32 matmul inputs.
    out_f32 = vit_embeddings(
        image, conv_weight, conv_bias, cls_token, pos_emb, patch_size,
        matmul_dtype=jnp.float32,
    )
    out_f32 = jax.block_until_ready(out_f32)
    assert jnp.allclose(out_f32, ref, atol=1e-4, rtol=1e-4)

    print("KERNEL_OK")
</pallas_src>

<mosaic_0001>
module attributes {stable_mosaic.version = 11 : i64} {
  func.func @_vit_embeddings_kernel(%arg0: i32, %arg1: memref<1x17x64xbf16, #tpu.memory_space<vmem>>, %arg2: memref<64x32xbf16, #tpu.memory_space<vmem>>, %arg3: memref<17x32xf32, #tpu.memory_space<vmem>>, %arg4: memref<1x17x32xf32, #tpu.memory_space<vmem>>) attributes {dimension_semantics = [#tpu.dimension_semantics<parallel>], iteration_bounds = array<i64: 2>, scalar_prefetch = 0 : i64, scratch_operands = 0 : i64, tpu.core_type = #tpu.core_type<tc>, window_params = [{transform_indices = @transform_0, window_bounds = array<i64: 1, 17, 64>}, {pipeline_mode = #tpu.pipeline_mode<synchronous>, transform_indices = @transform_1, window_bounds = array<i64: 64, 32>}, {pipeline_mode = #tpu.pipeline_mode<synchronous>, transform_indices = @transform_2, window_bounds = array<i64: 17, 32>}, {transform_indices = @transform_3, window_bounds = array<i64: 1, 17, 32>}]} {
    %c0 = arith.constant 0 : index
    %c0_0 = arith.constant 0 : index
    %0 = vector.load %arg3[%c0, %c0_0] : memref<17x32xf32, #tpu.memory_space<vmem>>, vector<17x32xf32>
    %c0_1 = arith.constant 0 : index
    %c0_2 = arith.constant 0 : index
    %c0_3 = arith.constant 0 : index
    %1 = vector.load %arg1[%c0_1, %c0_2, %c0_3] : memref<1x17x64xbf16, #tpu.memory_space<vmem>>, vector<1x17x64xbf16>
    %2 = vector.shape_cast %1 : vector<1x17x64xbf16> to vector<17x64xbf16>
    %c0_4 = arith.constant 0 : index
    %c0_5 = arith.constant 0 : index
    %3 = vector.load %arg2[%c0_4, %c0_5] : memref<64x32xbf16, #tpu.memory_space<vmem>>, vector<64x32xbf16>
    %cst = arith.constant dense<0.000000e+00> : vector<17x32xf32>
    %4 = tpu.matmul %2, %3, %cst {dimension_numbers = #tpu.dot_dimension_numbers<[1], [0], [0], [1], [0, 0, 1, 1], [], []>} : vector<17x64xbf16>, vector<64x32xbf16>, vector<17x32xf32> -> vector<17x32xf32>
    %5 = arith.addf %4, %0 : vector<17x32xf32>
    %c0_6 = arith.constant 0 : index
    %c0_7 = arith.constant 0 : index
    %c0_8 = arith.constant 0 : index
    %6 = vector.load %arg4[%c0_6, %c0_7, %c0_8] : memref<1x17x32xf32, #tpu.memory_space<vmem>>, vector<1x17x32xf32>
    %7 = vector.shape_cast %6 : vector<1x17x32xf32> to vector<17x32xf32>
    %8 = vector.shape_cast %5 : vector<17x32xf32> to vector<1x17x32xf32>
    tpu.vector_store %arg4[%c0_6, %c0_7, %c0_8], %8 {strides = array<i32>} : memref<1x17x32xf32, #tpu.memory_space<vmem>>, vector<1x17x32xf32>,
    return
  }
  func.func @transform_0(%arg0: i32) -> (i32, i32, i32) {
    %c0_i32 = arith.constant 0 : i32
    %c0_i32_0 = arith.constant 0 : i32
    %c0_i32_1 = arith.constant 0 : i32
    return %arg0, %c0_i32, %c0_i32_0 : i32, i32, i32
  }
  func.func @transform_1(%arg0: i32) -> (i32, i32) {
    %c0_i32 = arith.constant 0 : i32
    %c0_i32_0 = arith.constant 0 : i32
    %c0_i32_1 = arith.constant 0 : i32
    return %c0_i32, %c0_i32_0 : i32, i32
  }
  func.func @transform_2(%arg0: i32) -> (i32, i32) {
    %c0_i32 = arith.constant 0 : i32
    %c0_i32_0 = arith.constant 0 : i32
    %c0_i32_1 = arith.constant 0 : i32
    return %c0_i32, %c0_i32_0 : i32, i32
  }
  func.func @transform_3(%arg0: i32) -> (i32, i32, i32) {
    %c0_i32 = arith.constant 0 : i32
    %c0_i32_0 = arith.constant 0 : i32
    %c0_i32_1 = arith.constant 0 : i32
    return %arg0, %c0_i32, %c0_i32_0 : i32, i32, i32
  }
}

</mosaic_0001>

<bundles_post_ra>
// kernel: tpu_custom_call.1
= control target key start
LH: loop header
LB: loop body
LE: loop exit
PB: predicated region body
PF: predicated region fallthrough
CT: control target
= control target key end

     0   :  { %s381_s12 = smov 0   ;;  %s419_s0 = inlined_call_operand.vmem [shape: bf16[2,17,64], index: 0, kind: input, shape index: {}]   ;;  %s420_s1 = inlined_call_operand.vmem [shape: bf16[64,32], index: 1, kind: input, shape index: {}]   ;;  %s421_s2 = inlined_call_operand.vmem [shape: f32[17,32], index: 2, kind: input, shape index: {}]   ;;  %s422_s3 = inlined_call_operand.vmem [shape: f32[2,17,32], index: 3, kind: output, shape index: {}]  }
   0x1 LB: > { %s303_s13 = sadd.s32 4294967295, %s359_s12   ;;  %p307_p0 = scmp.ge.s32.totalorder %s359_s12, 1  ;;  %s359_s12 = sphi %s381_s12, %s13_s12  }
   0x2   : > { %p137_p1 = scmp.lt.s32.totalorder %s359_s12, 3 }
   0x4   : > { %p138_p2 = pnand %p307_p0, %p137_p1 }
   0x5   : > { %p161_p3 = scmp.lt.s32.totalorder (!%p138_p2), %s303_s13, 1 }
   0x6   : > { %141 = sbr.rel (%p138_p2) target bundleno = 164 (0xa4), region = 32 }
   0xb   : > { %v338_v0 = vld [vmem:[%s420_s1 + $0x18] sm:$0xff]  ;;  %v337_v1 = vld [vmem:[%s420_s1 + $0x10] sm:$0xff]  ;;  %s424_s13 = smov (!%p161_p3, %s303_s13), 1  ;;  %v336_v2 = vld [vmem:[%s420_s1 + $0x8] sm:$0xff]  ;;  %vm218_vm0 = vcmask 523264   ;;  %vm243_vm1 = vcmask 261120  }
   0xc   : > { %229 = vmatpush.bf16.msra.mxu0 %v338_v0  ;;  %339 = vmatpush.bf16.msra.mxu1 %v338_v0  ;;  %s343_s18 = smul.u32 12, %s424_s13  ;;  %v335_v5 = vld [vmem:[%s420_s1] sm:$0xff]  ;;  %v174_v9 = vld [vmem:[%s421_s2 + $0x10] sm:$0x1]  ;;  %vm246_vm2 = vcmask 253952   ;;  %v173_v14 = vld [vmem:[%s421_s2 + $0x8] sm:$0xff] }
   0xd   : > { %s344_s26 = smul.u32 24, %s424_s13  ;;  %v172_v8 = vld [vmem:[%s421_s2] sm:$0xff] }
   0xe   : > { %s165_s23 = scalar_lea.vmem %s419_s0, %s343_s18 }
   0xf   : > { %v177_v3 = vld [vmem:[%s165_s23 + $0x8] sm:$0x1]  ;;  %v334_v6 = vld [vmem:[%s165_s23] sm:$0xff]  ;;  %s170_s6 = scalar_lea.vmem %s422_s3, %s344_s26 }
  0x10   : > { %230 = vmatpush.bf16.msra.mxu0 %v337_v1  ;;  %340 = vmatpush.bf16.msra.mxu1 %v337_v1  ;;  %v191_v4 = vunpack.c.l.b16 %v177_v3 }
  0x12   : > { %v193_v7 = vpack.c.b16 %v191_v4, %v191_v4 }
  0x14   : > { %231 = vmatpush.bf16.msra.mxu0 %v336_v2  ;;  %341 = vmatpush.bf16.msra.mxu1 %v336_v2 }
  0x18   : > { %232 = vmatpush.bf16.msra.mxu0 %v335_v5  ;;  %342 = vmatpush.bf16.msra.mxu1 %v335_v5 }
  0x1b   : > { %330 = vmatmul.msk.bf16.vlgmr.msra.gmra.mxu0 %vm218_vm0, %v334_v6  ;;  %331 = vmatmul.msk.bf16.vlgmr.msra.gmra.mxu1 %vm218_vm0, %v193_v7 }
  0x98   : > { %v234_v10 = vpop.f32.mrf.mxu0  ;;  %v239_v11 = vpop.f32.mrf.mxu1 }
  0x99   : > { %v235_v12 = vadd.f32 %v234_v10, %v172_v8  ;;  %v240_v13 = vadd.f32 %v239_v11, %v174_v9 }
  0x9b   : > { %244 = vst.msk [vmem:[%s170_s6] sm:$0xff] %vm243_vm1, %v235_v12 }
  0x9c   : > { %247 = vst.msk [vmem:[%s170_s6 + $0x10] sm:$0x1] %vm246_vm2, %v240_v13 }
  0xa0   : > { %v236_v15 = vpop.f32.mrf.mxu0  ;;  %v241_v16 = vpop.f32.mrf.mxu1 }
  0xa1   : > { %v237_v17 = vadd.f32 %v236_v15, %v173_v14 }
  0xa3   : > { %245 = vst.msk [vmem:[%s170_s6 + $0x8] sm:$0xff] %vm243_vm1, %v237_v17 }
  0xa4 PF: > { %s13_s12 = sadd.s32 1, %s359_s12  }
  0xa5   : > { %p10_p4 = scmp.ge.s32.totalorder %s13_s12, 4  }
  0xa7   :  { %12 = sbr.rel (!%p10_p4) target bundleno = 1 (0x1), region = 62 }

</bundles_post_ra>
